<compile_context>
chip_gen: v7x
topology: tpu7x:2x2x1
jax: 0.10.0
libtpu: 0.0.40
codegen_flags: <defaults>
</compile_context>

<pallas_src>
import functools
import math

import jax
import jax.numpy as jnp
from jax.experimental import pallas as pl
from jax.experimental.pallas import tpu as pltpu


def _nmc_kernel(theta_s_ref, xt_ref, per_m_ref, per_n_ref, out_ref, *,
                const, chunk):
    """One grid step: a (tile_n)-wide slab of datapoints.

    theta_s_ref : (M, D)      theta pre-scaled by 1/sigma_obs^2 (matmul LHS)
    xt_ref      : (D, TN)     transposed tile of data points
    per_m_ref   : (M, 1)      -0.5/sigma^2 ||theta_m||^2 + log p(theta_m) - log q(theta_m)
    per_n_ref   : (1, TN)     -0.5/sigma^2 ||x_n||^2
    out_ref     : (1, TN)     log marginal likelihood estimate per datapoint
    const       : scalar      -0.5 D (log 2pi + 2 log sigma_obs) - log M
    """
    theta_s = theta_s_ref[...]                       # (M, D), resident across grid
    per_m = per_m_ref[...]                           # (M, 1)
    M = theta_s.shape[0]
    ones_row = jnp.ones((1, M), jnp.float32)         # hoisted: reused by every chunk
    tile_n = xt_ref.shape[1]

    # Static (fully unrolled) loop over 256-lane column chunks: bounds the live
    # (M, chunk) working set to ~32 vregs while keeping the large DMA tile.
    for col in range(0, tile_n, chunk):
        xt = xt_ref[:, col:col + chunk]                                   # (D, CH)
        # MXU: (M, D) @ (D, CH); 1/sigma^2 already folded into theta_s.
        cross = jnp.dot(theta_s, xt, preferred_element_type=jnp.float32)  # (M, CH)
        # Single broadcast-add builds the m-dependent part of the log-weights.
        log_w = cross + per_m                                             # (M, CH)
        # Numerically stable logsumexp over the MC-particle axis.
        m = jnp.max(log_w, axis=0, keepdims=True)                         # (1, CH)
        p = jnp.exp(log_w - m)                                            # (M, CH)
        # Sum over M on the (idle) MXU instead of a cross-sublane reduction.
        s = jnp.dot(ones_row, p, preferred_element_type=jnp.float32)      # (1, CH)
        # Per-datapoint and global constants added after the reduction.
        out_ref[:, col:col + chunk] = (m + jnp.log(s)
                                       + per_n_ref[:, col:col + chunk]
                                       + const)


def batched_nmc_log_marginal_likelihood(theta, x, mu_q, log_sigma_q,
                                        sigma_obs, *, tile_n=512, chunk_n=256):
    """Returns the NMC log-marginal-likelihood estimate per datapoint, shape (N,)."""
    M, D = theta.shape
    N, D2 = x.shape
    assert D == D2
    # TODO(synk): handle N % tile_n != 0 with a masked remainder tile.
    assert N % tile_n == 0 and tile_n % chunk_n == 0 and chunk_n % 128 == 0

    LOG2PI = math.log(2.0 * math.pi)
    sigma_obs = float(sigma_obs)
    inv_var = 1.0 / (sigma_obs * sigma_obs)

    theta = theta.astype(jnp.float32)
    x = x.astype(jnp.float32)
    mu_q = mu_q.astype(jnp.float32)
    log_sigma_q = log_sigma_q.astype(jnp.float32)

    # ---- Hoisted theta-only terms (computed once, O(M*D) total). ----
    theta_sq = jnp.sum(theta * theta, axis=-1, keepdims=True)            # (M, 1)
    log_prior = -0.5 * theta_sq - 0.5 * D * LOG2PI                       # (M, 1)
    z = (theta - mu_q[None, :]) * jnp.exp(-log_sigma_q)[None, :]
    log_q = (-0.5 * jnp.sum(z * z, axis=-1, keepdims=True)
             - jnp.sum(log_sigma_q) - 0.5 * D * LOG2PI)                  # (M, 1)
    per_m = (-0.5 * inv_var) * theta_sq + log_prior - log_q              # (M, 1)

    # 1/sigma^2 folded into the matmul LHS once (removes a per-step (M,TN) scale).
    theta_s = theta * inv_var                                            # (M, D)

    # ---- Hoisted per-datapoint terms; x fed pre-transposed (lane-dense). ----
    xt = x.T                                                             # (D, N)
    per_n = (-0.5 * inv_var) * jnp.sum(x * x, axis=-1)[None, :]          # (1, N)
    const = -0.5 * D * (LOG2PI + 2.0 * math.log(sigma_obs)) - math.log(M)

    kernel = functools.partial(_nmc_kernel, const=float(const), chunk=chunk_n)

    out = pl.pallas_call(
        kernel,
        out_shape=jax.ShapeDtypeStruct((1, N), jnp.float32),
        grid_spec=pltpu.PrefetchScalarGridSpec(
            num_scalar_prefetch=0,
            grid=(N // tile_n,),
            in_specs=[
                pl.BlockSpec((M, D), lambda i: (0, 0)),        # theta_s (grid-resident)
                pl.BlockSpec((D, tile_n), lambda i: (0, i)),   # x^T tile
                pl.BlockSpec((M, 1), lambda i: (0, 0)),        # per-particle vector
                pl.BlockSpec((1, tile_n), lambda i: (0, i)),   # per-datapoint vector
            ],
            out_specs=pl.BlockSpec((1, tile_n), lambda i: (0, i)),
        ),
        compiler_params=pltpu.CompilerParams(
            dimension_semantics=("parallel",)),
    )(theta_s, xt, per_m, per_n)
    return out.reshape(N)


def _reference(theta, x, mu_q, log_sigma_q, sigma_obs):
    """Pure-JAX reference of the same forward pass."""
    M, D = theta.shape
    LOG2PI = math.log(2.0 * math.pi)
    diff = x[None, :, :] - theta[:, None, :]                             # (M, N, D)
    log_lik = (-0.5 * jnp.sum(diff * diff, axis=-1) / sigma_obs**2
               - 0.5 * D * (LOG2PI + 2.0 * math.log(sigma_obs)))         # (M, N)
    log_prior = -0.5 * jnp.sum(theta * theta, axis=-1) - 0.5 * D * LOG2PI
    z = (theta - mu_q[None, :]) / jnp.exp(log_sigma_q)[None, :]
    log_q = (-0.5 * jnp.sum(z * z, axis=-1)
             - jnp.sum(log_sigma_q) - 0.5 * D * LOG2PI)
    log_w = log_lik + (log_prior - log_q)[:, None]
    return jax.scipy.special.logsumexp(log_w, axis=0) - math.log(M)


if __name__ == "__main__":
    # M = MC particles ("__particles_mc"), D = latent dim, N = datapoints
    # ("__particles_data").  N / tile_n = 2 so both v7x TensorCores stay busy.
    M, D, N = 64, 128, 1024
    sigma_obs = 0.5

    key = jax.random.PRNGKey(0)
    k_eps, k_x = jax.random.split(key)

    # Deterministic guide parameters (synthetic init, no checkpoint load).
    mu_q = 0.01 * jnp.arange(D, dtype=jnp.float32)
    log_sigma_q = -0.5 * jnp.ones((D,), jnp.float32)

    # theta_m ~ q(theta)  (reparameterized draw; sampling is glue, not kernel work)
    eps = jax.random.normal(k_eps, (M, D), jnp.float32)
    theta = mu_q[None, :] + jnp.exp(log_sigma_q)[None, :] * eps

    # Observed data batch (leftmost dim = data plate).
    x = jax.random.normal(k_x, (N, D), jnp.float32)

    out = batched_nmc_log_marginal_likelihood(theta, x, mu_q, log_sigma_q,
                                              sigma_obs, tile_n=512, chunk_n=256)
    out = jax.block_until_ready(out)

    ref = _reference(theta, x, mu_q, log_sigma_q, sigma_obs)
    assert out.shape == (N,)
    assert jnp.allclose(out, ref, rtol=1e-4, atol=1e-3), \
        float(jnp.max(jnp.abs(out - ref)))

    print("KERNEL_OK")
</pallas_src>

<mosaic_0001>
module attributes {stable_mosaic.version = 11 : i64} {
  func.func @_nmc_kernel(%arg0: i32, %arg1: memref<64x128xf32, #tpu.memory_space<vmem>>, %arg2: memref<128x512xf32, #tpu.memory_space<vmem>>, %arg3: memref<64x1xf32, #tpu.memory_space<vmem>>, %arg4: memref<1x512xf32, #tpu.memory_space<vmem>>, %arg5: memref<1x512xf32, #tpu.memory_space<vmem>>) attributes {dimension_semantics = [#tpu.dimension_semantics<parallel>], iteration_bounds = array<i64: 2>, scalar_prefetch = 0 : i64, scratch_operands = 0 : i64, tpu.core_type = #tpu.core_type<tc>, window_params = [{pipeline_mode = #tpu.pipeline_mode<synchronous>, transform_indices = @transform_0, window_bounds = array<i64: 64, 128>}, {transform_indices = @transform_1, window_bounds = array<i64: 128, 512>}, {pipeline_mode = #tpu.pipeline_mode<synchronous>, transform_indices = @transform_2, window_bounds = array<i64: 64, 1>}, {transform_indices = @transform_3, window_bounds = array<i64: 1, 512>}, {transform_indices = @transform_4, window_bounds = array<i64: 1, 512>}]} {
    %c0 = arith.constant 0 : index
    %c0_0 = arith.constant 0 : index
    %0 = vector.load %arg1[%c0, %c0_0] : memref<64x128xf32, #tpu.memory_space<vmem>>, vector<64x128xf32>
    %c0_1 = arith.constant 0 : index
    %c0_2 = arith.constant 0 : index
    %1 = vector.load %arg3[%c0_1, %c0_2] : memref<64x1xf32, #tpu.memory_space<vmem>>, vector<64x1xf32>
    %cst = arith.constant 1.000000e+00 : f32
    %2 = vector.broadcast %cst : f32 to vector<1x64xf32>
    %c0_3 = arith.constant 0 : index
    %c0_4 = arith.constant 0 : index
    %3 = vector.load %arg2[%c0_3, %c0_4] : memref<128x512xf32, #tpu.memory_space<vmem>>, vector<128x256xf32>
    %cst_5 = arith.constant dense<0.000000e+00> : vector<64x256xf32>
    %4 = tpu.matmul %0, %3, %cst_5 {dimension_numbers = #tpu.dot_dimension_numbers<[1], [0], [0], [1], [0, 0, 1, 1], [], []>} : vector<64x128xf32>, vector<128x256xf32>, vector<64x256xf32> -> vector<64x256xf32>
    %5 = vector.broadcast %1 : vector<64x1xf32> to vector<64x256xf32>
    %6 = arith.addf %4, %5 : vector<64x256xf32>
    %cst_6 = arith.constant dense<0xFF800000> : vector<256xf32>
    %7 = vector.multi_reduction <maximumf>, %6, %cst_6 [0] : vector<64x256xf32> to vector<256xf32>
    %8 = vector.shape_cast %7 : vector<256xf32> to vector<1x256xf32>
    %9 = vector.broadcast %8 : vector<1x256xf32> to vector<64x256xf32>
    %10 = arith.subf %6, %9 : vector<64x256xf32>
    %11 = math.exp %10 : vector<64x256xf32>
    %cst_7 = arith.constant dense<0.000000e+00> : vector<1x256xf32>
    %12 = tpu.matmul %2, %11, %cst_7 {dimension_numbers = #tpu.dot_dimension_numbers<[1], [0], [0], [1], [0, 0, 1, 1], [], []>} : vector<1x64xf32>, vector<64x256xf32>, vector<1x256xf32> -> vector<1x256xf32>
    %13 = math.log %12 : vector<1x256xf32>
    %14 = arith.addf %8, %13 : vector<1x256xf32>
    %c0_8 = arith.constant 0 : index
    %c0_9 = arith.constant 0 : index
    %15 = vector.load %arg4[%c0_8, %c0_9] : memref<1x512xf32, #tpu.memory_space<vmem>>, vector<1x256xf32>
    %16 = arith.addf %14, %15 : vector<1x256xf32>
    %cst_10 = arith.constant -33.0601768 : f32
    %17 = vector.broadcast %cst_10 : f32 to vector<1x256xf32>
    %18 = arith.addf %16, %17 : vector<1x256xf32>
    %c0_11 = arith.constant 0 : index
    %c0_12 = arith.constant 0 : index
    %19 = vector.load %arg5[%c0_11, %c0_12] : memref<1x512xf32, #tpu.memory_space<vmem>>, vector<1x256xf32>
    tpu.vector_store %arg5[%c0_11, %c0_12], %18 {strides = array<i32>} : memref<1x512xf32, #tpu.memory_space<vmem>>, vector<1x256xf32>,
    %c0_13 = arith.constant 0 : index
    %c256 = arith.constant 256 : index
    %20 = vector.load %arg2[%c0_13, %c256] : memref<128x512xf32, #tpu.memory_space<vmem>>, vector<128x256xf32>
    %cst_14 = arith.constant dense<0.000000e+00> : vector<64x256xf32>
    %21 = tpu.matmul %0, %20, %cst_14 {dimension_numbers = #tpu.dot_dimension_numbers<[1], [0], [0], [1], [0, 0, 1, 1], [], []>} : vector<64x128xf32>, vector<128x256xf32>, vector<64x256xf32> -> vector<64x256xf32>
    %22 = vector.broadcast %1 : vector<64x1xf32> to vector<64x256xf32>
    %23 = arith.addf %21, %22 : vector<64x256xf32>
    %cst_15 = arith.constant dense<0xFF800000> : vector<256xf32>
    %24 = vector.multi_reduction <maximumf>, %23, %cst_15 [0] : vector<64x256xf32> to vector<256xf32>
    %25 = vector.shape_cast %24 : vector<256xf32> to vector<1x256xf32>
    %26 = vector.broadcast %25 : vector<1x256xf32> to vector<64x256xf32>
    %27 = arith.subf %23, %26 : vector<64x256xf32>
    %28 = math.exp %27 : vector<64x256xf32>
    %cst_16 = arith.constant dense<0.000000e+00> : vector<1x256xf32>
    %29 = tpu.matmul %2, %28, %cst_16 {dimension_numbers = #tpu.dot_dimension_numbers<[1], [0], [0], [1], [0, 0, 1, 1], [], []>} : vector<1x64xf32>, vector<64x256xf32>, vector<1x256xf32> -> vector<1x256xf32>
    %30 = math.log %29 : vector<1x256xf32>
    %31 = arith.addf %25, %30 : vector<1x256xf32>
    %c0_17 = arith.constant 0 : index
    %c256_18 = arith.constant 256 : index
    %32 = vector.load %arg4[%c0_17, %c256_18] : memref<1x512xf32, #tpu.memory_space<vmem>>, vector<1x256xf32>
    %33 = arith.addf %31, %32 : vector<1x256xf32>
    %cst_19 = arith.constant -33.0601768 : f32
    %34 = vector.broadcast %cst_19 : f32 to vector<1x256xf32>
    %35 = arith.addf %33, %34 : vector<1x256xf32>
    %c0_20 = arith.constant 0 : index
    %c256_21 = arith.constant 256 : index
    %36 = vector.load %arg5[%c0_20, %c256_21] : memref<1x512xf32, #tpu.memory_space<vmem>>, vector<1x256xf32>
    tpu.vector_store %arg5[%c0_20, %c256_21], %35 {strides = array<i32>} : memref<1x512xf32, #tpu.memory_space<vmem>>, vector<1x256xf32>,
    return
  }
  func.func @transform_0(%arg0: i32) -> (i32, i32) {
    %c0_i32 = arith.constant 0 : i32
    %c0_i32_0 = arith.constant 0 : i32
    %c0_i32_1 = arith.constant 0 : i32
    return %c0_i32, %c0_i32_0 : i32, i32
  }
  func.func @transform_1(%arg0: i32) -> (i32, i32) {
    %c0_i32 = arith.constant 0 : i32
    %c0_i32_0 = arith.constant 0 : i32
    return %c0_i32, %arg0 : i32, i32
  }
  func.func @transform_2(%arg0: i32) -> (i32, i32) {
    %c0_i32 = arith.constant 0 : i32
    %c0_i32_0 = arith.constant 0 : i32
    %c0_i32_1 = arith.constant 0 : i32
    return %c0_i32, %c0_i32_0 : i32, i32
  }
  func.func @transform_3(%arg0: i32) -> (i32, i32) {
    %c0_i32 = arith.constant 0 : i32
    %c0_i32_0 = arith.constant 0 : i32
    return %c0_i32, %arg0 : i32, i32
  }
  func.func @transform_4(%arg0: i32) -> (i32, i32) {
    %c0_i32 = arith.constant 0 : i32
    %c0_i32_0 = arith.constant 0 : i32
    return %c0_i32, %arg0 : i32, i32
  }
}

</mosaic_0001>

<bundles_post_ra>
// kernel: tpu_custom_call.1
= control target key start
LH: loop header
LB: loop body
LE: loop exit
PB: predicated region body
PF: predicated region fallthrough
CT: control target
= control target key end

     0   :  { %9 = vsyncpa [#allocation3], 0  ;;  %s1990_s0 = inlined_call_operand.vmem [shape: f32[64,128], index: 0, kind: input, shape index: {}]   ;;  %s1991_s1 = inlined_call_operand.hbm [shape: f32[128,1024], index: 1, kind: input, shape index: {}]   ;;  %s1992_s2 = inlined_call_operand.vmem [shape: f32[64,1], index: 2, kind: input, shape index: {}]   ;;  %s1993_s3 = inlined_call_operand.vmem [shape: f32[1,1024], index: 3, kind: input, shape index: {}]   ;;  %s1994_s4 = inlined_call_operand.hbm [shape: f32[1,1024], index: 4, kind: output, shape index: {}]  }
   0x1   :  { %11 = vsyncpa [#allocation3 + $0x1], 0 }
   0x2   :  { %12 = vsyncpa [#allocation4], 0 }
   0x3   :  { %14 = vsyncpa [#allocation4 + $0x1], 0  ;;  %s1431_s15 = smov 0   ;;  %s1433_s16 = smov 0  }
   0x4   :  { %s1435_s17 = smov 0   ;;  %s1437_s18 = smov 0  }
   0x5 LB: > { %s1452_s19 = sadd.s32 4294967295, %s1395_s18   ;;  %s1057_s20 = sadd.s32 4294967294, %s1395_s18   ;;  %s1395_s18 = sphi %s1437_s18, %s2010_s18   ;;  %s1391_s17 = sphi %s1435_s17, %s2009_s17   ;;  %s1387_s16 = sphi %s1433_s16, %s2008_s16   ;;  %s1383_s15 = sphi %s1431_s15, %s2007_s15  }
   0x6   : > { %s1456_s21 = sadd.s32 1, %s1395_s18   ;;  %s48_s22 = sadd.s32 1, %s1391_s17 }
   0x7   : > { %s45_s23 = ssub.s32 %s1395_s18, %s1456_s21  ;;  %p55_p0 = scmp.ne.s32.totalorder %s1391_s17, %s1387_s16 }
   0x8   : > { %p46_p1 = scmp.eq.s32.totalorder %s45_s23, 0  ;;  %p56_p2 = scmp.eq.s32.totalorder %s1395_s18, 0 }
   0x9   : > { %p61_p3 = scmp.ne.s32.totalorder %s1387_s16, %s1383_s15  ;;  %p62_p4 = scmp.eq.s32.totalorder %s1452_s19, 0 }
   0xa   : > { %s1468_s24 = scalar_select %p46_p1, %s1391_s17, %s48_s22  }
   0xb   : > { %p1470_p5 = por %p56_p2, %p55_p0  ;;  %p1474_p6 = por %p62_p4, %p61_p3 }
   0xc   : > { %p132_p7 = scmp.eq.s32.totalorder %s1452_s19, 1  ;;  %p138_p8 = scmp.eq.s32.totalorder %s1057_s20, 1 }
   0xd   : > { %p1184_p10 = scmp.lt.s32.totalorder %s1395_s18, 2  ;;  %s164_s29 = sand.u32 1, %s1391_s17  }
   0xe   : > { %p1481_p11 = por %p132_p7, %p55_p0  ;;  %p1485_p12 = por %p138_p8, %p61_p3 }
   0xf   : > { %s1074_s30 = sshll.u32 %s1395_s18, 9  ;;  %s1060_s5 = sshll.u32 %s164_s29, 9 }
  0x10   : > { %s1998_s27 = scalar_select %p1481_p11, 1, 0 }
  0x11   : > { %s1999_s28 = scalar_select %p1485_p12, 1, 0 }
  0x12   : > { %s1494_s8 = scalar_lea.hbm %s1991_s1, %s1074_s30  ;;  %s168_s9 = scalar_lea.vmem [#allocation2], %s1060_s5 }
  0x13   : > { %s175_s10 = sshll.u32 %s168_s9, 4  ;;  %p1498_p13 = pnand %p1184_p10, %p1470_p5  ;;  %s1502_s10 = int_to_ptr.vmem [resolvable:$true] %s175_s10 }
  0x14   : > { %s1505_s12 = scalar_lea.sflag [#allocation3], %s164_s29  ;;  %s1299_s13 = scalar_lea.hbm %s1494_s8, 8192 }
  0x15   : > { %p1300_p1 = scmp.ne.s32.totalorder %s1494_s8, %s1299_s13  ;;  %p1301_p2 = pneg %p1498_p13 }
  0x16   : > { %s1304_s22 = scalar_lea.hbm %s1991_s1, 16384  ;;  %p1305_p5 = scmp.lt.u32.totalorder %s1494_s8, %s1991_s1 }
  0x17   : > { %p1302_p3 = pnand %p1301_p2, %p1300_p1  ;;  %p1306_p7 = scmp.lt.u32.totalorder %s1304_s22, %s1299_s13 }
  0x18   : > { %p1308_p10 = scmp.lt.u32.totalorder %s1299_s13, %s1494_s8 }
  0x19   : > { %p1303_p4 = pneg %p1302_p3  ;;  %p1307_p8 = por %p1306_p7, %p1305_p5 }
  0x1b   : > { %p1309_p9 = por %p1308_p10, %p1307_p8 }
  0x1d   : > { %p1310_p0 = pnand %p1309_p9, %p1303_p4 }
  0x1f   : > { %1313 = shalt.err (!%p1310_p0)
}
  0x20   : > { %s1314_s29 = scalar_lea.vmem %s1502_s10, 8192  ;;  %s1397_s30 = smov [#allocation2]  }
  0x21   : > { %p1315_p1 = scmp.ne.s32.totalorder %s1502_s10, %s1314_s29  ;;  %s1319_s5 = sshll.u32 %s1397_s30, 4  ;;  %s1320_s5 = int_to_ptr.vmem [resolvable:$false] %s1319_s5 }
  0x22   : > { %s1321_s6 = scalar_lea.vmem %s1320_s5, 16384  ;;  %p1322_p11 = scmp.lt.s32.totalorder %s1502_s10, %s1320_s5 }
  0x23   : > { %p1317_p3 = pnand %p1315_p1, %p1301_p2  ;;  %p1323_p5 = scmp.lt.s32.totalorder %s1321_s6, %s1314_s29 }
  0x25   : > { %p1318_p12 = pneg %p1317_p3  ;;  %p1324_p7 = por %p1323_p5, %p1322_p11 }
  0x27   : > { %p1325_p8 = pnand %p1324_p7, %p1318_p12 }
  0x29   : > { %1328 = shalt.err (!%p1325_p8)
}
  0x2a   : > { %s1398_s7 = smov 1024   ;;  %s1399_s9 = smov 512  }
  0x2b   : > { %s1400_s13 = smov 32   ;;  %p191_p9 = scmp.lt.s32.totalorder %s1395_s18, 3 }
  0x2c   : > { %1179 = dma.hbm_to_vmem [thread:$0]  (!%p1498_p13), %s1494_s8, 8192, %s1502_s10, %s1505_s12, %s1398_s7, %s1399_s9, %s1400_s13  }
  0x2d   : > { %p2001_p0 = scmp.ge.s32.totalorder %s1395_s18, 1 }
  0x2f   : > { %p192_p2 = pnand %p2001_p0, %p191_p9 }
  0x30   : > { %s1537_s14 = sand.u32 (!%p192_p2), 1, %s1387_s16  }
  0x31   : > { %195 = sbr.rel (%p192_p2) target bundleno = 967 (0x3c7), region = 36  ;;  %s1064_s20 = sshll.u32 (!%p192_p2), %s1537_s14, 9 }
  0x32   : > { %s198_s22 = scalar_lea.sflag (!%p192_p2), [#allocation3], %s1537_s14  ;;  %s1541_s23 = scalar_lea.vmem (!%p192_p2), [#allocation2], %s1064_s20 }
  0x38   : > { %1374 = dma.done.wait (%p1474_p6), %s198_s22, 8192  }
  0x39   : > { %1376 = vsyncadd (%p1474_p6), %s198_s22, 4294959104  ;;  %v1401_v0 = vmov 0.0   ;;  %v1402_v1 = vmov 0   ;;  %v254_v2 = vld [vmem:[%s1541_s23 + $0x8] sm:$0xff]  ;;  %v253_v4 = vld [vmem:[%s1541_s23] sm:$0xff]  ;;  %vm512_vm0 = vcmask 523264  }
  0x3a   : > { %389 = vmatprep.mubr.f32.mxu0 %v1401_v0  ;;  %1225 = vset.pattern.permute.xlu0 %v1402_v1  ;;  %v256_v3 = vld [vmem:[%s1541_s23 + $0x28] sm:$0xff]  ;;  %v255_v6 = vld [vmem:[%s1541_s23 + $0x20] sm:$0xff]  ;;  %v247_v34 = vld [vmem:[%s1992_s2 + $0x10] sm:$0xff]  ;;  %s1065_s25 = sshll.u32 %s1537_s14, 2  ;;  %s1075_s30 = sshll.u32 %s1452_s19, 6 }
  0x3b   : > { %1226 = vset.pattern.permute.xlu1 %v1402_v1  ;;  %580 = vmatprep.mubr.f32.mxu1 %v1401_v0  ;;  %v1076_v5 = vpack.c.bf16 %v256_v3, %v254_v2  ;;  %v258_v7 = vld [vmem:[%s1541_s23 + $0x48] sm:$0xff]  ;;  %v1078_v9 = vpack.c.bf16 %v255_v6, %v253_v4  ;;  %v257_v11 = vld [vmem:[%s1541_s23 + $0x40] sm:$0xff]  ;;  %v248_v37 = vld [vmem:[%s1992_s2 + $0x18] sm:$0xff]  ;;  %s1842_s29 = scalar_lea.vmem [#allocation5], %s1065_s25  ;;  %s1943_s9 = scalar_lea.hbm %s1994_s4, %s1075_s30 }
  0x3c   : > { %v260_v8 = vld [vmem:[%s1541_s23 + $0x68] sm:$0xff]  ;;  %v259_v12 = vld [vmem:[%s1541_s23 + $0x60] sm:$0xff]  ;;  %297 = vperm.xlu1 %1226, %v247_v34   ;;  %v251_v51 = vld [vmem:[%s1992_s2 + $0x30] sm:$0xff]  ;;  %s978_s5 = sshll.u32 %s1842_s29, 4  ;;  %s964_s13 = scalar_lea.sflag [#allocation4], %s1537_s14  ;;  %s1945_s5 = int_to_ptr.vmem [resolvable:$true] %s978_s5 }
  0x3d   : > { %v1080_v10 = vpack.c.bf16 %v260_v8, %v258_v7  ;;  %v262_v13 = vld [vmem:[%s1541_s23 + $0x88] sm:$0xff]  ;;  %1077 = vmatprep.subr.bf16.mxu0 %v1076_v5  ;;  %v1082_v15 = vpack.c.bf16 %v259_v12, %v257_v11  ;;  %v261_v17 = vld [vmem:[%s1541_s23 + $0x80] sm:$0xff]  ;;  %v252_v53 = vld [vmem:[%s1992_s2 + $0x38] sm:$0xff]  ;;  %p2004_p12 = scmp.ne.s32.totalorder %s1998_s27, 0  ;;  %s1405_s20 = smov [#allocation5]  }
  0x3e   : > { %v264_v14 = vld [vmem:[%s1541_s23 + $0xa8] sm:$0xff]  ;;  %1079 = vmatpush1.bf16.msra.mxu0 %v1078_v9  ;;  %v263_v18 = vld [vmem:[%s1541_s23 + $0xa0] sm:$0xff]  ;;  %v1622_v60 = vld [vmem:[%s1990_s0 + $0x10] sm:$0xff]  ;;  %s1333_s22 = sshll.u32 %s1405_s20, 4  ;;  %s1334_s22 = int_to_ptr.vmem [resolvable:$false] %s1333_s22 }
  0x3f   : > { %1081 = vmatprep.subr.bf16.mxu0 %v1080_v10  ;;  %v1084_v16 = vpack.c.bf16 %v264_v14, %v262_v13  ;;  %v266_v19 = vld [vmem:[%s1541_s23 + $0xc8] sm:$0xff]  ;;  %v1086_v21 = vpack.c.bf16 %v263_v18, %v261_v17  ;;  %v265_v23 = vld [vmem:[%s1541_s23 + $0xc0] sm:$0xff]  ;;  %v1629_v61 = vld [vmem:[%s1990_s0 + $0x18] sm:$0xff]  ;;  %s1335_s26 = scalar_lea.vmem %s1334_s22, 128  ;;  %p1336_p10 = scmp.lt.s32.totalorder %s1945_s5, %s1334_s22 }
  0x40   : > { %v268_v20 = vld [vmem:[%s1541_s23 + $0xe8] sm:$0xff]  ;;  %v267_v24 = vld [vmem:[%s1541_s23 + $0xe0] sm:$0xff]  ;;  %302 = vperm.xlu1 %1226, %v248_v37   ;;  %v1650_v1 = vld [vmem:[%s1990_s0 + $0x30] sm:$0xff] }
  0x41   : > { %v1088_v22 = vpack.c.bf16 %v268_v20, %v266_v19  ;;  %v270_v25 = vld [vmem:[%s1541_s23 + $0x108] sm:$0xff]  ;;  %v1090_v27 = vpack.c.bf16 %v267_v24, %v265_v23  ;;  %v269_v29 = vld [vmem:[%s1541_s23 + $0x100] sm:$0xff]  ;;  %v1657_v2 = vld [vmem:[%s1990_s0 + $0x38] sm:$0xff] }
  0x42   : > { %1083 = vmatpush1.bf16.msra.mxu0 %v1082_v15  ;;  %v272_v26 = vld [vmem:[%s1541_s23 + $0x128] sm:$0xff]  ;;  %v271_v30 = vld [vmem:[%s1541_s23 + $0x120] sm:$0xff] }
  0x43   : > { %1085 = vmatprep.subr.bf16.mxu0 %v1084_v16  ;;  %v1092_v28 = vpack.c.bf16 %v272_v26, %v270_v25  ;;  %v245_v31 = vld [vmem:[%s1992_s2] sm:$0xff]  ;;  %v274_v32 = vld [vmem:[%s1541_s23 + $0x148] sm:$0xff]  ;;  %v1094_v36 = vpack.c.bf16 %v271_v30, %v269_v29 }
  0x44   : > { %v276_v33 = vld [vmem:[%s1541_s23 + $0x168] sm:$0xff]  ;;  %287 = vperm.xlu0 %1225, %v245_v31   ;;  %v273_v39 = vld [vmem:[%s1541_s23 + $0x140] sm:$0xff] }
  0x45   : > { %v246_v35 = vld [vmem:[%s1992_s2 + $0x8] sm:$0xff]  ;;  %v1096_v38 = vpack.c.bf16 %v276_v33, %v274_v32  ;;  %v275_v40 = vld [vmem:[%s1541_s23 + $0x160] sm:$0xff] }
  0x46   : > { %1087 = vmatpush1.bf16.msra.mxu0 %v1086_v21  ;;  %v278_v41 = vld [vmem:[%s1541_s23 + $0x188] sm:$0xff]  ;;  %v249_v43 = vld [vmem:[%s1992_s2 + $0x20] sm:$0xff]  ;;  %v1098_v44 = vpack.c.bf16 %v275_v40, %v273_v39 }
  0x47   : > { %1089 = vmatprep.subr.bf16.mxu0 %v1088_v22  ;;  %v280_v42 = vld [vmem:[%s1541_s23 + $0x1a8] sm:$0xff]  ;;  %v277_v47 = vld [vmem:[%s1541_s23 + $0x180] sm:$0xff] }
  0x48   : > { %292 = vperm.xlu0 %1225, %v246_v35   ;;  %v250_v45 = vld [vmem:[%s1992_s2 + $0x28] sm:$0xff]  ;;  %v1100_v46 = vpack.c.bf16 %v280_v42, %v278_v41  ;;  %v279_v48 = vld [vmem:[%s1541_s23 + $0x1a0] sm:$0xff] }
  0x49   : > { %v282_v49 = vld [vmem:[%s1541_s23 + $0x1c8] sm:$0xff]  ;;  %312 = vperm.xlu1 %1226, %v250_v45   ;;  %v1102_v52 = vpack.c.bf16 %v279_v48, %v277_v47  ;;  %v281_v55 = vld [vmem:[%s1541_s23 + $0x1c0] sm:$0xff] }
  0x4a   : > { %1091 = vmatpush1.bf16.msra.mxu0 %v1090_v27  ;;  %v284_v50 = vld [vmem:[%s1541_s23 + $0x1e8] sm:$0xff]  ;;  %v283_v56 = vld [vmem:[%s1541_s23 + $0x1e0] sm:$0xff] }
  0x4b   : > { %1093 = vmatprep.subr.bf16.mxu0 %v1092_v28  ;;  %v1104_v54 = vpack.c.bf16 %v284_v50, %v282_v49  ;;  %v1106_v57 = vpack.c.bf16 %v283_v56, %v281_v55  ;;  %v1608_v58 = vld [vmem:[%s1990_s0] sm:$0xff]  ;;  %v1615_v59 = vld [vmem:[%s1990_s0 + $0x8] sm:$0xff] }
  0x4c   : > { %307 = vperm.xlu0 %1225, %v249_v43   ;;  %v1636_v62 = vld [vmem:[%s1990_s0 + $0x20] sm:$0xff]  ;;  %v1643_v63 = vld [vmem:[%s1990_s0 + $0x28] sm:$0xff] }
  0x4d   : > { %322 = vperm.xlu1 %1226, %v252_v53  }
  0x4e   : > { %1095 = vmatpush1.bf16.msra.mxu0 %v1094_v36 }
  0x4f   : > { %1097 = vmatprep.subr.bf16.mxu0 %v1096_v38 }
  0x50   : > { %317 = vperm.xlu0 %1225, %v251_v51  }
  0x52   : > { %1099 = vmatpush1.bf16.msra.mxu0 %v1098_v44 }
  0x53   : > { %1101 = vmatprep.subr.bf16.mxu0 %v1100_v46 }
  0x56   : > { %1103 = vmatpush1.bf16.msra.mxu0 %v1102_v52 }
  0x57   : > { %1105 = vmatprep.subr.bf16.mxu0 %v1104_v54 }
  0x5a   : > { %1107 = vmatpush1.bf16.msra.mxu0 %v1106_v57 }
  0x5d   : > { %390 = vmatmul.mubr.f32.vlgmr.msra.gmra.mrb[0].mxu0 %v1608_v58 }
  0x5e   : > { %395 = vmatprep.mubr.f32.mxu0 %v1401_v0 }
  0x61   : > { %396 = vmatmul.mubr.f32.gmra.mrb[2].mxu0 %v1615_v59 }
  0x62   : > { %401 = vmatprep.mubr.f32.mxu0 %v1401_v0 }
  0x65   : > { %402 = vmatmul.mubr.f32.gmra.mrb[4].mxu0 %v1622_v60 }
  0x66   : > { %407 = vmatprep.mubr.f32.mxu0 %v1401_v0 }
  0x69   : > { %408 = vmatmul.mubr.f32.gmra.mrb[6].mxu0 %v1629_v61 }
  0x6a   : > { %413 = vmatprep.mubr.f32.mxu0 %v1401_v0 }
  0x6d   : > { %414 = vmatmul.mubr.f32.gmra.mrb[8].mxu0 %v1636_v62 }
  0x6e   : > { %419 = vmatprep.mubr.f32.mxu0 %v1401_v0 }
  0x71   : > { %420 = vmatmul.mubr.f32.gmra.mrb[10].mxu0 %v1643_v63 }
  0x72   : > { %425 = vmatprep.mubr.f32.mxu0 %v1401_v0 }
  0x75   : > { %426 = vmatmul.mubr.f32.gmra.mrb[12].mxu0 %v1650_v1 }
  0x76   : > { %431 = vmatprep.mubr.f32.mxu0 %v1401_v0 }
  0x79   : > { %432 = vmatmul.mubr.f32.gmra.mrb[14].mxu0 %v1657_v2 }
  0x7a   : > { %915 = vmatprep.mubr.f32.mxu0 %v1401_v0 }
  0xbb   : > { %v1663_v8 = vpop.permute.xlu1 %297 }
  0xbf   : > { %v1681_v17 = vpop.permute.xlu1 %302 }
  0xc3   : > { %v1661_v5 = vpop.permute.xlu0 %287 }
  0xc7   : > { %v1674_v14 = vpop.permute.xlu0 %292 }
  0xc8   : > { %v1707_v33 = vpop.permute.xlu1 %312 }
  0xcb   : > { %v1697_v26 = vpop.permute.xlu0 %307 }
  0xcc   : > { %v1727_v47 = vpop.permute.xlu1 %322 }
  0xcf   : > { %v1717_v40 = vpop.permute.xlu0 %317 }
 0x130   : > { %v391_v3 = vpop.f32.mrb[0].mxu0 }
 0x131   : > { %v393_v4 = vpop.f32.mrb[1].mxu0  ;;  %v1666_v10 = vadd.f32 %v391_v3, %v1661_v5 }
 0x132   : > { %v1672_v13 = vadd.f32 %v393_v4, %v1661_v5 }
 0x134   : > { %v397_v6 = vpop.f32.mrb[2].mxu0 }
 0x135   : > { %v399_v7 = vpop.f32.mrb[3].mxu0  ;;  %v1686_v20 = vadd.f32 %v397_v6, %v1674_v14 }
 0x136   : > { %v400_v23 = vadd.f32 %v399_v7, %v1674_v14 }
 0x138   : > { %v403_v9 = vpop.f32.mrb[4].mxu0 }
 0x139   : > { %v1669_v11 = vadd.f32 %v403_v9, %v1663_v8  ;;  %v405_v12 = vpop.f32.mrb[5].mxu0 }
 0x13a   : > { %v1677_v15 = vadd.f32 %v405_v12, %v1663_v8 }
 0x13b   : > { %v438_v16 = vmax.f32 %v1666_v10, %v1669_v11 }
 0x13c   : > { %v451_v18 = vmax.f32 %v1672_v13, %v1677_v15  ;;  %v409_v19 = vpop.f32.mrb[6].mxu0 }
 0x13d   : > { %v1689_v21 = vadd.f32 %v409_v19, %v1681_v17  ;;  %v411_v22 = vpop.f32.mrb[7].mxu0 }
 0x13e   : > { %v1693_v24 = vadd.f32 %v411_v22, %v1681_v17 }
 0x13f   : > { %v439_v25 = vmax.f32 %v1686_v20, %v1689_v21 }
 0x140   : > { %v452_v27 = vmax.f32 %v400_v23, %v1693_v24  ;;  %v415_v28 = vpop.f32.mrb[8].mxu0 }
 0x141   : > { %v1701_v29 = vadd.f32 %v415_v28, %v1697_v26  ;;  %v417_v30 = vpop.f32.mrb[9].mxu0 }
 0x142   : > { %v1704_v31 = vadd.f32 %v417_v30, %v1697_v26 }
 0x143   : > { %v440_v32 = vmax.f32 %v438_v16, %v1701_v29 }
 0x144   : > { %v453_v34 = vmax.f32 %v451_v18, %v1704_v31  ;;  %v421_v35 = vpop.f32.mrb[10].mxu0 }
 0x145   : > { %v1711_v36 = vadd.f32 %v421_v35, %v1707_v33  ;;  %v423_v37 = vpop.f32.mrb[11].mxu0 }
 0x146   : > { %v1714_v38 = vadd.f32 %v423_v37, %v1707_v33 }
 0x147   : > { %v441_v39 = vmax.f32 %v439_v25, %v1711_v36 }
 0x148   : > { %v454_v41 = vmax.f32 %v452_v27, %v1714_v38  ;;  %v427_v42 = vpop.f32.mrb[12].mxu0 }
 0x149   : > { %v1721_v43 = vadd.f32 %v427_v42, %v1717_v40  ;;  %v429_v44 = vpop.f32.mrb[13].mxu0 }
 0x14a   : > { %v1724_v45 = vadd.f32 %v429_v44, %v1717_v40 }
 0x14b   : > { %v442_v46 = vmax.f32 %v440_v32, %v1721_v43 }
 0x14c   : > { %v455_v48 = vmax.f32 %v453_v34, %v1724_v45  ;;  %v433_v49 = vpop.f32.mrb[14].mxu0 }
 0x14d   : > { %v434_v50 = vadd.f32 %v433_v49, %v1727_v47  ;;  %v435_v51 = vpop.f32.mrb[15].mxu0 }
 0x14e   : > { %v436_v52 = vadd.f32 %v435_v51, %v1727_v47 }
 0x14f   : > { %v443_v53 = vmax.f32 %v441_v39, %v434_v50 }
 0x150   : > { %v456_v54 = vmax.f32 %v454_v41, %v436_v52 }
 0x151   : > { %v444_v55 = vmax.f32 %v442_v46, %v443_v53 }
 0x152   : > { %v457_v56 = vmax.f32 %v455_v48, %v456_v54 }
 0x153   : > { %v445_v57 = vrot.slane %v444_v55, 4 }
 0x154   : > { %v458_v3 = vrot.slane %v457_v56, 4 }
 0x155   : > { %v446_v4 = vmax.f32 %v444_v55, %v445_v57 }
 0x156   : > { %v459_v6 = vmax.f32 %v457_v56, %v458_v3 }
 0x157   : > { %v447_v7 = vrot.slane %v446_v4, 2 }
 0x158   : > { %v460_v9 = vrot.slane %v459_v6, 2 }
 0x159   : > { %v448_v12 = vmax.f32 %v446_v4, %v447_v7 }
 0x15a   : > { %v461_v16 = vmax.f32 %v459_v6, %v460_v9 }
 0x15b   : > { %v449_v18 = vrot.slane %v448_v12, 1 }
 0x15c   : > { %v462_v19 = vrot.slane %v461_v16, 1 }
 0x15d   : > { %v1732_v22 = vmax.f32 %v448_v12, %v449_v18 }
 0x15e   : > { %v1734_v25 = vmax.f32 %v461_v16, %v462_v19 }
 0x15f   : > { %v478_v27 = vsub.f32 %v434_v50, %v1732_v22  ;;  %v464_v28 = vsub.f32 %v1666_v10, %v1732_v22  ;;  %v466_v35 = vsub.f32 %v1686_v20, %v1732_v22  ;;  %v470_v20 = vsub.f32 %v1689_v21, %v1732_v22 }
 0x160   : > { %v479_v30 = vsub.f32 %v436_v52, %v1734_v25  ;;  %v465_v32 = vsub.f32 %v1672_v13, %v1734_v25  ;;  %v467_v34 = vsub.f32 %v400_v23, %v1734_v25  ;;  %v469_v39 = vsub.f32 %v1677_v15, %v1734_v25 }
 0x161   : > { %v508_v37 = vmul.f32 1.442695, %v478_v27  ;;  %v471_v10 = vsub.f32 %v1693_v24, %v1734_v25  ;;  %v480_v46 = vmul.f32 1.442695, %v464_v28  ;;  %v468_v13 = vsub.f32 %v1669_v11, %v1732_v22 }
 0x162   : > { %v510_v41 = vmul.f32 1.442695, %v479_v30  ;;  %v482_v42 = vmul.f32 1.442695, %v465_v32  ;;  %v486_v44 = vmul.f32 1.442695, %v467_v34  ;;  %v473_v15 = vsub.f32 %v1704_v31, %v1734_v25 }
 0x163   : > { %1227 = vpow2.f32 %v508_v37  ;;  %v484_v23 = vmul.f32 1.442695, %v466_v35  ;;  %v490_v48 = vmul.f32 1.442695, %v469_v39  ;;  %v494_v49 = vmul.f32 1.442695, %v471_v10 }
 0x164   : > { %1229 = vpow2.f32 %v510_v41  ;;  %v475_v24 = vsub.f32 %v1714_v38, %v1734_v25  ;;  %v488_v50 = vmul.f32 1.442695, %v468_v13  ;;  %v472_v11 = vsub.f32 %v1701_v29, %v1732_v22  ;;  %v633_v41 = vld [vmem:[%s1541_s23 + $0x18] sm:$0xff] }
 0x165   : > { %1231 = vpow2.f32 %v482_v42  ;;  %v492_v51 = vmul.f32 1.442695, %v470_v20  ;;  %v474_v21 = vsub.f32 %v1711_v36, %v1732_v22  ;;  %v498_v52 = vmul.f32 1.442695, %v473_v15  ;;  %v635_v42 = vld [vmem:[%s1541_s23 + $0x38] sm:$0xff]  ;;  %v634_v20 = vld [vmem:[%s1541_s23 + $0x30] sm:$0xff] }
 0x166   : > { %1233 = vpow2.f32 %v486_v44  ;;  %v477_v31 = vsub.f32 %v1724_v45, %v1734_v25  ;;  %v502_v53 = vmul.f32 1.442695, %v475_v24  ;;  %v476_v38 = vsub.f32 %v1721_v43, %v1732_v22  ;;  %v639_v15 = vld [vmem:[%s1541_s23 + $0x78] sm:$0xff] }
 0x167   : > { %1235 = vpow2.f32 %v480_v46  ;;  %v496_v54 = vmul.f32 1.442695, %v472_v11  ;;  %v500_v55 = vmul.f32 1.442695, %v474_v21  ;;  %v1124_v13 = vpack.c.bf16 %v635_v42, %v633_v41  ;;  %v638_v11 = vld [vmem:[%s1541_s23 + $0x70] sm:$0xff]  ;;  %v643_v21 = vld [vmem:[%s1541_s23 + $0xb8] sm:$0xff] }
 0x168   : > { %1237 = vpow2.f32 %v484_v23  ;;  %v506_v56 = vmul.f32 1.442695, %v477_v31  ;;  %v504_v36 = vmul.f32 1.442695, %v476_v38  ;;  %v632_v23 = vld [vmem:[%s1541_s23 + $0x10] sm:$0xff]  ;;  %v661_v41 = vld [vmem:[%s1541_s23 + $0x1d8] sm:$0xff] }
 0x169   : > { %1239 = vpow2.f32 %v490_v48  ;;  %v637_v48 = vld [vmem:[%s1541_s23 + $0x58] sm:$0xff]  ;;  %v640_v38 = vld [vmem:[%s1541_s23 + $0x90] sm:$0xff] }
 0x16a   : > { %1241 = vpow2.f32 %v494_v49  ;;  %v1126_v49 = vpack.c.bf16 %v634_v20, %v632_v23  ;;  %v1128_v24 = vpack.c.bf16 %v639_v15, %v637_v48  ;;  %v663_v42 = vld [vmem:[%s1541_s23 + $0x1f8] sm:$0xff] }
 0x16b   : > { %1243 = vpow2.f32 %v488_v50  ;;  %v636_v50 = vld [vmem:[%s1541_s23 + $0x50] sm:$0xff] }
 0x16c   : > { %1245 = vpow2.f32 %v492_v51  ;;  %v641_v51 = vld [vmem:[%s1541_s23 + $0x98] sm:$0xff]  ;;  %v1130_v31 = vpack.c.bf16 %v638_v11, %v636_v50 }
 0x16d   : > { %v1228_v29 = vpop.eup %1227  ;;  %1247 = vpow2.f32 %v498_v52  ;;  %v1403_v52 = vmov 1.0  }
 0x16e   : > { %v1230_v57 = vpop.eup %1229  ;;  %1249 = vpow2.f32 %v502_v53  ;;  %v1132_v53 = vpack.c.bf16 %v643_v21, %v641_v51 }
 0x16f   : > { %v1232_v3 = vpop.eup %1231  ;;  %1251 = vpow2.f32 %v496_v54  ;;  %v642_v54 = vld [vmem:[%s1541_s23 + $0xb0] sm:$0xff] }
 0x170   : > { %v1234_v4 = vpop.eup %1233  ;;  %1253 = vpow2.f32 %v500_v55  ;;  %v645_v55 = vld [vmem:[%s1541_s23 + $0xd8] sm:$0xff] }
 0x171   : > { %v1236_v45 = vpop.eup %1235  ;;  %v1108_v6 = vpack.c.bf16 %v1234_v4, %v1232_v3  ;;  %1255 = vpow2.f32 %v506_v56  ;;  %v1134_v56 = vpack.c.bf16 %v642_v54, %v640_v38  ;;  %v646_v3 = vld [vmem:[%s1541_s23 + $0xf0] sm:$0xff]  ;;  %v649_v4 = vld [vmem:[%s1541_s23 + $0x118] sm:$0xff] }
 0x172   : > { %v1238_v7 = vpop.eup %1237  ;;  %1257 = vpow2.f32 %v504_v36  ;;  %v644_v36 = vld [vmem:[%s1541_s23 + $0xd0] sm:$0xff] }
 0x173   : > { %v1240_v43 = vpop.eup %1239  ;;  %1109 = vmatprep.subr.bf16.mxu1 %v1108_v6  ;;  %v1110_v9 = vpack.c.bf16 %v1238_v7, %v1236_v45  ;;  %v651_v45 = vld [vmem:[%s1541_s23 + $0x138] sm:$0xff]  ;;  %v1138_v6 = vpack.c.bf16 %v646_v3, %v644_v36 }
 0x174   : > { %v1242_v12 = vpop.eup %1241  ;;  %v1140_v7 = vpack.c.bf16 %v651_v45, %v649_v4 }
 0x175   : > { %v1244_v16 = vpop.eup %1243  ;;  %1111 = vmatpush1.bf16.msra.mxu1 %v1110_v9  ;;  %v1112_v18 = vpack.c.bf16 %v1242_v12, %v1240_v43  ;;  %v648_v43 = vld [vmem:[%s1541_s23 + $0x110] sm:$0xff]  ;;  %v653_v12 = vld [vmem:[%s1541_s23 + $0x158] sm:$0xff] }
 0x176   : > { %v1246_v19 = vpop.eup %1245  ;;  %v650_v9 = vld [vmem:[%s1541_s23 + $0x130] sm:$0xff] }
 0x177   : > { %v1248_v27 = vpop.eup %1247  ;;  %1113 = vmatprep.subr.bf16.mxu1 %v1112_v18  ;;  %v1114_v28 = vpack.c.bf16 %v1246_v19, %v1244_v16  ;;  %v655_v16 = vld [vmem:[%s1541_s23 + $0x178] sm:$0xff]  ;;  %v1142_v18 = vpack.c.bf16 %v650_v9, %v648_v43 }
 0x178   : > { %v1250_v30 = vpop.eup %1249  ;;  %v1144_v19 = vpack.c.bf16 %v655_v16, %v653_v12 }
 0x179   : > { %v1252_v32 = vpop.eup %1251  ;;  %1115 = vmatpush1.bf16.msra.mxu1 %v1114_v28  ;;  %v1116_v34 = vpack.c.bf16 %v1250_v30, %v1248_v27  ;;  %v652_v27 = vld [vmem:[%s1541_s23 + $0x150] sm:$0xff]  ;;  %v657_v30 = vld [vmem:[%s1541_s23 + $0x198] sm:$0xff] }
 0x17a   : > { %v1254_v35 = vpop.eup %1253  ;;  %v654_v28 = vld [vmem:[%s1541_s23 + $0x170] sm:$0xff] }
 0x17b   : > { %v1256_v37 = vpop.eup %1255  ;;  %1117 = vmatprep.subr.bf16.mxu1 %v1116_v34  ;;  %v1118_v39 = vpack.c.bf16 %v1254_v35, %v1252_v32  ;;  %v659_v32 = vld [vmem:[%s1541_s23 + $0x1b8] sm:$0xff]  ;;  %v1146_v34 = vpack.c.bf16 %v654_v28, %v652_v27 }
 0x17c   : > { %v1258_v44 = vpop.eup %1257  ;;  %v1120_v10 = vpack.c.bf16 %v1230_v57, %v1256_v37  ;;  %v1148_v35 = vpack.c.bf16 %v659_v32, %v657_v30  ;;  %v656_v37 = vld [vmem:[%s1541_s23 + $0x190] sm:$0xff] }
 0x17d   : > { %1119 = vmatpush1.bf16.msra.mxu1 %v1118_v39  ;;  %v1122_v46 = vpack.c.bf16 %v1228_v29, %v1258_v44  ;;  %v647_v29 = vld [vmem:[%s1541_s23 + $0xf8] sm:$0xff]  ;;  %v658_v39 = vld [vmem:[%s1541_s23 + $0x1b0] sm:$0xff] }
 0x17e   : > { %1121 = vmatprep.subr.bf16.mxu1 %v1120_v10  ;;  %v1136_v57 = vpack.c.bf16 %v647_v29, %v645_v55  ;;  %v1150_v44 = vpack.c.bf16 %v658_v39, %v656_v37  ;;  %v1152_v10 = vpack.c.bf16 %v663_v42, %v661_v41 }
 0x181   : > { %1123 = vmatpush1.bf16.msra.mxu1 %v1122_v46  ;;  %v660_v46 = vld [vmem:[%s1541_s23 + $0x1d0] sm:$0xff] }
 0x182   : > { %1125 = vmatprep.subr.bf16.mxu1 %v1124_v13  ;;  %v662_v13 = vld [vmem:[%s1541_s23 + $0x1f0] sm:$0xff]  ;;  %s1066_s23 = sshll.u32 %s1452_s19, 2  ;;  %s1329_s19 = scalar_lea.vmem %s1945_s5, 64 }
 0x183   : > { %v1154_v23 = vpack.c.bf16 %v662_v13, %v660_v46  ;;  %p232_p6 = scmp.lt.s32.totalorder %s1066_s23, 7  ;;  %p1330_p11 = scmp.ne.s32.totalorder %s1945_s5, %s1329_s19 }
 0x184   : > { %1067 = vmatmul.mubr.msk.f32.vlgmr.msra.gmra.mrb[0].mxu1 %vm512_vm0, %v1403_v52  ;;  %p1337_p1 = scmp.lt.s32.totalorder %s1335_s26, %s1329_s19 }
 0x185   : > { %1127 = vmatpush1.bf16.msra.mxu1 %v1126_v49  ;;  %728 = vmatprep.mubr.f32.mxu1 %v1401_v0  ;;  %s2012_s23 = smov (!%p232_p6, %s1066_s23), 7  ;;  %p1331_p13 = pnand %p1330_p11, %p2004_p12 }
 0x186   : > { %1129 = vmatprep.subr.bf16.mxu1 %v1128_v24  ;;  %s1821_s12 = scalar_lea.vmem %s1993_s3, %s2012_s23  ;;  %p1338_p3 = por %p1337_p1, %p1336_p10 }
 0x187   : > { %p1332_p4 = pneg %p1331_p13 }
 0x189   : > { %1131 = vmatpush1.bf16.msra.mxu1 %v1130_v31  ;;  %p1339_p5 = pnand %p1338_p3, %p1332_p4 }
 0x18a   : > { %1133 = vmatprep.subr.bf16.mxu1 %v1132_v53 }
 0x18d   : > { %1135 = vmatpush1.bf16.msra.mxu1 %v1134_v56 }
 0x18e   : > { %1137 = vmatprep.subr.bf16.mxu1 %v1136_v57 }
 0x191   : > { %1139 = vmatpush1.bf16.msra.mxu1 %v1138_v6 }
 0x192   : > { %1141 = vmatprep.subr.bf16.mxu1 %v1140_v7 }
 0x195   : > { %1143 = vmatpush1.bf16.msra.mxu1 %v1142_v18 }
 0x196   : > { %1145 = vmatprep.subr.bf16.mxu1 %v1144_v19 }
 0x199   : > { %1147 = vmatpush1.bf16.msra.mxu1 %v1146_v34 }
 0x19a   : > { %1149 = vmatprep.subr.bf16.mxu1 %v1148_v35 }
 0x19d   : > { %1151 = vmatpush1.bf16.msra.mxu1 %v1150_v44 }
 0x19e   : > { %1153 = vmatprep.subr.bf16.mxu1 %v1152_v10 }
 0x1a1   : > { %1155 = vmatpush1.bf16.msra.mxu1 %v1154_v23 }
 0x1a4   : > { %729 = vmatmul.mubr.f32.vlgmr.msra.gmra.mrb[2].mxu1 %v1608_v58 }
 0x1a5   : > { %734 = vmatprep.mubr.f32.mxu1 %v1401_v0 }
 0x1a8   : > { %735 = vmatmul.mubr.f32.gmra.mrb[4].mxu1 %v1615_v59  ;;  %v595_v59 = vlaneseq }
 0x1a9   : > { %740 = vmatprep.mubr.f32.mxu1 %v1401_v0 }
 0x1aa   : > { %vm1837_vm1 = vcmp.lt.s32.totalorder %v595_v59, 256 }
 0x1ac   : > { %741 = vmatmul.mubr.f32.gmra.mrb[6].mxu1 %v1622_v60 }
 0x1ad   : > { %746 = vmatprep.mubr.f32.mxu1 %v1401_v0 }
 0x1b0   : > { %747 = vmatmul.mubr.f32.gmra.mrb[8].mxu1 %v1629_v61  ;;  %v1816_v61 = vshrl.u32 %v595_v59, 7 }
 0x1b1   : > { %752 = vmatprep.mubr.f32.mxu1 %v1401_v0 }
 0x1b4   : > { %753 = vmatmul.mubr.f32.gmra.mrb[10].mxu1 %v1636_v62  ;;  %v593_v62 = vld [vmem:[%s1821_s12] sm:$0x3] }
 0x1b5   : > { %758 = vmatprep.mubr.f32.mxu1 %v1401_v0 }
 0x1b8   : > { %759 = vmatmul.mubr.f32.gmra.mrb[12].mxu1 %v1643_v63  ;;  %v601_v63 = vsub.s32 1, %v1816_v61 }
 0x1b9   : > { %764 = vmatprep.mubr.f32.mxu1 %v1401_v0 }
 0x1ba   : > { %v602_v50 = vrot.slane %v593_v62, %v601_v63 }
 0x1bc   : > { %765 = vmatmul.mubr.f32.gmra.mrb[14].mxu1 %v1650_v1 }
 0x1bd   : > { %770 = vmatprep.mubr.f32.mxu1 %v1401_v0  ;;  %v597_v0 = vsub.s32 0, %v1816_v61 }
 0x1bf   : > { %v598_v49 = vrot.slane %v593_v62, %v597_v0 }
 0x1c0   : > { %771 = vmatmul.mubr.f32.gmra.mrb[16].mxu1 %v1657_v2  ;;  %v1404_v2 = vmov 1966171168  }
 0x1c1   : > { %v613_v20 = vunpack.c.l.s4 %v1404_v2 }
 0x1c3   : > { %v614_v21 = vunpack.c.0.s8 %v613_v20 }
 0x1c5   : > { %v1833_v55 = vsub.s32 %v614_v21, %v1816_v61 }
 0x257   : > { %v582_v58 = vpop.f32.mrb[0].mxu1 }
 0x258   : > { %1259 = vlog2.f32 %v582_v58  ;;  %v584_v60 = vpop.f32.mrb[1].mxu1 }
 0x259   : > { %1261 = vlog2.f32 %v584_v60 }
 0x262   : > { %v1260_v1 = vpop.eup %1259 }
 0x263   : > { %v1262_v48 = vpop.eup %1261  ;;  %v588_v15 = vmul.f32 0.6931472, %v1260_v1 }
 0x264   : > { %v590_v24 = vmul.f32 0.6931472, %v1262_v48 }
 0x265   : > { %v591_v11 = vadd.f32 %v588_v15, %v1732_v22 }
 0x266   : > { %v592_v51 = vadd.f32 %v590_v24, %v1734_v25 }
 0x267   : > { %v605_v31 = vadd.f32 %v598_v49, %v591_v11 }
 0x268   : > { %v606_v53 = vadd.f32 %v602_v50, %v592_v51 }
 0x269   : > { %v607_v38 = vadd.f32 -33.060177, %v605_v31 }
 0x26a   : > { %v608_v54 = vadd.f32 -33.060177, %v606_v53 }
 0x26c   : > { %v611_v29 = vcombine.low %v607_v38, %v608_v54 }
 0x26e   : > { %v618_v56 = vrot.slane %v611_v29, %v1833_v55 }
 0x270   : > { %v625_v22 = vrot.slane %v618_v56, %v1833_v55 }
 0x272   : > { %631 = vst.msk [vmem:[%s1842_s29] sm:$0x3] %vm1837_vm1, %v625_v22 }
 0x277   : > { %v730_v25 = vpop.f32.mrb[2].mxu1 }
 0x278   : > { %v732_v36 = vpop.f32.mrb[3].mxu1  ;;  %v1848_v6 = vadd.f32 %v730_v25, %v1661_v5 }
 0x279   : > { %v733_v9 = vadd.f32 %v732_v36, %v1661_v5 }
 0x27b   : > { %v736_v3 = vpop.f32.mrb[4].mxu1 }
 0x27c   : > { %v738_v4 = vpop.f32.mrb[5].mxu1  ;;  %v737_v27 = vadd.f32 %v736_v3, %v1674_v14 }
 0x27d   : > { %v739_v32 = vadd.f32 %v738_v4, %v1674_v14 }
 0x27f   : > { %v742_v45 = vpop.f32.mrb[6].mxu1 }
 0x280   : > { %v1851_v7 = vadd.f32 %v742_v45, %v1663_v8  ;;  %v744_v43 = vpop.f32.mrb[7].mxu1 }
 0x281   : > { %v1855_v12 = vadd.f32 %v744_v43, %v1663_v8 }
 0x282   : > { %v777_v16 = vmax.f32 %v1848_v6, %v1851_v7 }
 0x283   : > { %v790_v18 = vmax.f32 %v733_v9, %v1855_v12  ;;  %v748_v19 = vpop.f32.mrb[8].mxu1 }
 0x284   : > { %v1862_v28 = vadd.f32 %v748_v19, %v1681_v17  ;;  %v750_v30 = vpop.f32.mrb[9].mxu1 }
 0x285   : > { %v1866_v34 = vadd.f32 %v750_v30, %v1681_v17 }
 0x286   : > { %v778_v5 = vmax.f32 %v737_v27, %v1862_v28 }
 0x287   : > { %v791_v8 = vmax.f32 %v739_v32, %v1866_v34  ;;  %v754_v35 = vpop.f32.mrb[10].mxu1 }
 0x288   : > { %v1871_v37 = vadd.f32 %v754_v35, %v1697_v26  ;;  %v756_v39 = vpop.f32.mrb[11].mxu1 }
 0x289   : > { %v1874_v41 = vadd.f32 %v756_v39, %v1697_v26 }
 0x28a   : > { %v779_v42 = vmax.f32 %v777_v16, %v1871_v37 }
 0x28b   : > { %v792_v44 = vmax.f32 %v790_v18, %v1874_v41  ;;  %v760_v14 = vpop.f32.mrb[12].mxu1 }
 0x28c   : > { %v1879_v17 = vadd.f32 %v760_v14, %v1707_v33  ;;  %v762_v10 = vpop.f32.mrb[13].mxu1 }
 0x28d   : > { %v1882_v46 = vadd.f32 %v762_v10, %v1707_v33 }
 0x28e   : > { %v780_v13 = vmax.f32 %v778_v5, %v1879_v17 }
 0x28f   : > { %v793_v23 = vmax.f32 %v791_v8, %v1882_v46  ;;  %v766_v58 = vpop.f32.mrb[14].mxu1 }
 0x290   : > { %v1887_v26 = vadd.f32 %v766_v58, %v1717_v40  ;;  %v768_v59 = vpop.f32.mrb[15].mxu1 }
 0x291   : > { %v1890_v60 = vadd.f32 %v768_v59, %v1717_v40 }
 0x292   : > { %v781_v62 = vmax.f32 %v779_v42, %v1887_v26 }
 0x293   : > { %v794_v1 = vmax.f32 %v792_v44, %v1890_v60  ;;  %v772_v2 = vpop.f32.mrb[16].mxu1 }
 0x294   : > { %v773_v33 = vadd.f32 %v772_v2, %v1727_v47  ;;  %v774_v20 = vpop.f32.mrb[17].mxu1 }
 0x295   : > { %v775_v48 = vadd.f32 %v774_v20, %v1727_v47 }
 0x296   : > { %v782_v15 = vmax.f32 %v780_v13, %v773_v33 }
 0x297   : > { %v795_v49 = vmax.f32 %v793_v23, %v775_v48 }
 0x298   : > { %v783_v24 = vmax.f32 %v781_v62, %v782_v15 }
 0x299   : > { %v796_v50 = vmax.f32 %v794_v1, %v795_v49 }
 0x29a   : > { %v784_v11 = vrot.slane %v783_v24, 4 }
 0x29b   : > { %v797_v51 = vrot.slane %v796_v50, 4 }
 0x29c   : > { %v785_v21 = vmax.f32 %v783_v24, %v784_v11 }
 0x29d   : > { %v798_v31 = vmax.f32 %v796_v50, %v797_v51 }
 0x29e   : > { %v786_v40 = vrot.slane %v785_v21, 2 }
 0x29f   : > { %v799_v53 = vrot.slane %v798_v31, 2 }
 0x2a0   : > { %v787_v38 = vmax.f32 %v785_v21, %v786_v40 }
 0x2a1   : > { %v800_v54 = vmax.f32 %v798_v31, %v799_v53 }
 0x2a2   : > { %v788_v29 = vrot.slane %v787_v38, 1 }
 0x2a3   : > { %v801_v56 = vrot.slane %v800_v54, 1 }
 0x2a4   : > { %v1896_v22 = vmax.f32 %v787_v38, %v788_v29 }
 0x2a5   : > { %v1898_v25 = vmax.f32 %v800_v54, %v801_v56 }
 0x2a6   : > { %v817_v47 = vsub.f32 %v773_v33, %v1896_v22  ;;  %v803_v36 = vsub.f32 %v1848_v6, %v1896_v22  ;;  %v805_v43 = vsub.f32 %v737_v27, %v1896_v22  ;;  %v807_v35 = vsub.f32 %v1851_v7, %v1896_v22 }
 0x2a7   : > { %v818_v3 = vsub.f32 %v775_v48, %v1898_v25  ;;  %v804_v4 = vsub.f32 %v733_v9, %v1898_v25  ;;  %v806_v45 = vsub.f32 %v739_v32, %v1898_v25  ;;  %v808_v18 = vsub.f32 %v1855_v12, %v1898_v25 }
 0x2a8   : > { %v847_v16 = vmul.f32 1.442695, %v817_v47  ;;  %v810_v8 = vsub.f32 %v1866_v34, %v1898_v25  ;;  %v819_v6 = vmul.f32 1.442695, %v803_v36  ;;  %v823_v9 = vmul.f32 1.442695, %v805_v43 }
 0x2a9   : > { %v849_v19 = vmul.f32 1.442695, %v818_v3  ;;  %v821_v30 = vmul.f32 1.442695, %v804_v4  ;;  %v825_v5 = vmul.f32 1.442695, %v806_v45  ;;  %v809_v27 = vsub.f32 %v1862_v28, %v1896_v22 }
 0x2aa   : > { %1263 = vpow2.f32 %v847_v16  ;;  %v829_v32 = vmul.f32 1.442695, %v808_v18  ;;  %v812_v12 = vsub.f32 %v1874_v41, %v1898_v25  ;;  %v833_v39 = vmul.f32 1.442695, %v810_v8  ;;  %v928_v3 = vld [vmem:[%s1821_s12 + $0x2] sm:$0x3] }
 0x2ab   : > { %1265 = vpow2.f32 %v849_v19  ;;  %v814_v34 = vsub.f32 %v1882_v46, %v1898_v25  ;;  %v827_v42 = vmul.f32 1.442695, %v807_v35  ;;  %v811_v7 = vsub.f32 %v1871_v37, %v1896_v22 }
 0x2ac   : > { %1267 = vpow2.f32 %v821_v30  ;;  %v831_v44 = vmul.f32 1.442695, %v809_v27  ;;  %v813_v28 = vsub.f32 %v1879_v17, %v1896_v22  ;;  %v837_v14 = vmul.f32 1.442695, %v812_v12 }
 0x2ad   : > { %1269 = vpow2.f32 %v825_v5  ;;  %v816_v41 = vsub.f32 %v1890_v60, %v1898_v25  ;;  %v841_v10 = vmul.f32 1.442695, %v814_v34  ;;  %v815_v46 = vsub.f32 %v1887_v26, %v1896_v22 }
 0x2ae   : > { %1271 = vpow2.f32 %v819_v6  ;;  %v835_v13 = vmul.f32 1.442695, %v811_v7  ;;  %v839_v23 = vmul.f32 1.442695, %v813_v28  ;;  %v933_v16 = vrot.slane %v928_v3, %v597_v0 }
 0x2af   : > { %1273 = vpow2.f32 %v823_v9  ;;  %v845_v58 = vmul.f32 1.442695, %v816_v41  ;;  %v843_v17 = vmul.f32 1.442695, %v815_v46  ;;  %v937_v19 = vrot.slane %v928_v3, %v601_v63 }
 0x2b0   : > { %1275 = vpow2.f32 %v829_v32 }
 0x2b1   : > { %1277 = vpow2.f32 %v833_v39 }
 0x2b2   : > { %1279 = vpow2.f32 %v827_v42 }
 0x2b3   : > { %1281 = vpow2.f32 %v831_v44 }
 0x2b4   : > { %v1264_v37 = vpop.eup %1263  ;;  %1283 = vpow2.f32 %v837_v14 }
 0x2b5   : > { %v1266_v59 = vpop.eup %1265  ;;  %1285 = vpow2.f32 %v841_v10 }
 0x2b6   : > { %v1268_v62 = vpop.eup %1267  ;;  %1287 = vpow2.f32 %v835_v13 }
 0x2b7   : > { %v1270_v1 = vpop.eup %1269  ;;  %1289 = vpow2.f32 %v839_v23 }
 0x2b8   : > { %v1272_v60 = vpop.eup %1271  ;;  %v1156_v2 = vpack.c.bf16 %v1270_v1, %v1268_v62  ;;  %1291 = vpow2.f32 %v845_v58 }
 0x2b9   : > { %v1274_v33 = vpop.eup %1273  ;;  %1293 = vpow2.f32 %v843_v17 }
 0x2ba   : > { %v1276_v26 = vpop.eup %1275  ;;  %1157 = vmatprep.subr.bf16.mxu0 %v1156_v2  ;;  %v1158_v20 = vpack.c.bf16 %v1274_v33, %v1272_v60 }
 0x2bb   : > { %v1278_v48 = vpop.eup %1277 }
 0x2bc   : > { %v1280_v15 = vpop.eup %1279  ;;  %1159 = vmatpush1.bf16.msra.mxu0 %v1158_v20  ;;  %v1160_v49 = vpack.c.bf16 %v1278_v48, %v1276_v26 }
 0x2bd   : > { %v1282_v24 = vpop.eup %1281 }
 0x2be   : > { %v1284_v50 = vpop.eup %1283  ;;  %1161 = vmatprep.subr.bf16.mxu0 %v1160_v49  ;;  %v1162_v11 = vpack.c.bf16 %v1282_v24, %v1280_v15 }
 0x2bf   : > { %v1286_v51 = vpop.eup %1285 }
 0x2c0   : > { %v1288_v21 = vpop.eup %1287  ;;  %1163 = vmatpush1.bf16.msra.mxu0 %v1162_v11  ;;  %v1164_v31 = vpack.c.bf16 %v1286_v51, %v1284_v50 }
 0x2c1   : > { %v1290_v40 = vpop.eup %1289 }
 0x2c2   : > { %v1292_v53 = vpop.eup %1291  ;;  %1165 = vmatprep.subr.bf16.mxu0 %v1164_v31  ;;  %v1166_v38 = vpack.c.bf16 %v1290_v40, %v1288_v21 }
 0x2c3   : > { %v1294_v54 = vpop.eup %1293  ;;  %v1168_v29 = vpack.c.bf16 %v1266_v59, %v1292_v53 }
 0x2c4   : > { %1167 = vmatpush1.bf16.msra.mxu0 %v1166_v38  ;;  %v1170_v56 = vpack.c.bf16 %v1264_v37, %v1294_v54 }
 0x2c5   : > { %1169 = vmatprep.subr.bf16.mxu0 %v1168_v29 }
 0x2c8   : > { %1171 = vmatpush1.bf16.msra.mxu0 %v1170_v56 }
 0x2cb   : > { %1068 = vmatmul.mubr.msk.f32.vlgmr.msra.gmra.mrb[16].mxu0 %vm512_vm0, %v1403_v52 }
 0x39e   : > { %v917_v47 = vpop.f32.mrb[16].mxu0 }
 0x39f   : > { %1295 = vlog2.f32 %v917_v47  ;;  %v919_v36 = vpop.f32.mrb[17].mxu0 }
 0x3a0   : > { %1297 = vlog2.f32 %v919_v36 }
 0x3a9   : > { %v1296_v4 = vpop.eup %1295 }
 0x3aa   : > { %v1298_v45 = vpop.eup %1297  ;;  %v923_v43 = vmul.f32 0.6931472, %v1296_v4 }
 0x3ab   : > { %v925_v18 = vmul.f32 0.6931472, %v1298_v45 }
 0x3ac   : > { %v926_v52 = vadd.f32 %v923_v43, %v1896_v22 }
 0x3ad   : > { %v927_v30 = vadd.f32 %v925_v18, %v1898_v25 }
 0x3ae   : > { %v940_v5 = vadd.f32 %v933_v16, %v926_v52 }
 0x3af   : > { %v941_v8 = vadd.f32 %v937_v19, %v927_v30 }
 0x3b0   : > { %v942_v6 = vadd.f32 -33.060177, %v940_v5 }
 0x3b1   : > { %v943_v35 = vadd.f32 -33.060177, %v941_v8 }
 0x3b3   : > { %v946_v9 = vcombine.low %v942_v6, %v943_v35 }
 0x3b5   : > { %v953_v0 = vrot.slane %v946_v9, %v1833_v55 }
 0x3b7   : > { %v960_v27 = vrot.slane %v953_v0, %v1833_v55 }
 0x3b9   : > { %962 = vst.msk [vmem:[%s1842_s29 + $0x2] sm:$0x3] %vm1837_vm1, %v960_v27 }
 0x3ba   : > { %1342 = shalt.err (!%p1339_p5)
}
 0x3bb   : > { %s1343_s14 = scalar_lea.hbm %s1943_s9, 64  ;;  %s1347_s10 = scalar_lea.hbm %s1994_s4, 128 }
 0x3bc   : > { %p1344_p7 = scmp.ne.s32.totalorder %s1943_s9, %s1343_s14  ;;  %p1348_p0 = scmp.lt.u32.totalorder %s1943_s9, %s1994_s4 }
 0x3bd   : > { %p1349_p2 = scmp.lt.u32.totalorder %s1347_s10, %s1343_s14  ;;  %p1351_p11 = scmp.lt.u32.totalorder %s1343_s14, %s1943_s9 }
 0x3be   : > { %p1345_p8 = pnand %p1344_p7, %p2004_p12 }
 0x3bf   : > { %p1350_p6 = por %p1349_p2, %p1348_p0 }
 0x3c0   : > { %p1346_p9 = pneg %p1345_p8 }
 0x3c1   : > { %p1352_p13 = por %p1351_p11, %p1350_p6 }
 0x3c3   : > { %p1353_p4 = pnand %p1352_p13, %p1346_p9 }
 0x3c5   : > { %1356 = shalt.err (!%p1353_p4)
}
 0x3c6   : > { %1174 = dma.vmem_to_hbm [thread:$0]  (%p2004_p12), %s1945_s5, 64, %s1943_s9, %s964_s13  }
 0x3c7 PF: > { %s990_s25 = sand.u32 1, %s1383_s15   ;;  %p2005_p10 = scmp.ne.s32.totalorder %s1999_s28, 0 }
 0x3c8   : > { %p2006_p1 = scmp.ge.s32.totalorder %s1395_s18, 2  ;;  %s991_s29 = scalar_lea.sflag [#allocation4], %s990_s25 }
 0x3ca   : > { %p1181_p3 = pnand %p2006_p1, %p2005_p10 }
 0x3cc   : > { %1378 = dma.done.wait (!%p1181_p3), %s991_s29, 64  }
 0x3cd   : > { %1380 = vsyncadd (!%p1181_p3), %s991_s29, 4294967232  ;;  %p17_p5 = scmp.ge.s32.totalorder %s1456_s21, 4   ;;  %s2007_s15 = smov %s1387_s16 }
 0x3ce   : > { %s2008_s16 = smov %s1391_s17  ;;  %s2009_s17 = smov %s1468_s24 }
 0x3cf   : > { %s2010_s18 = smov %s1456_s21  ;;  %19 = sbr.rel (!%p17_p5) target bundleno = 5 (0x5), region = 84 }
 0x3d6   :  { %996 = vsyncpa [#allocation3], 1 }
 0x3d7   :  { %998 = vsyncpa [#allocation3 + $0x1], 1 }
 0x3d8   :  { %999 = vsyncpa [#allocation4], 1 }
 0x3d9   :  { %1001 = vsyncpa [#allocation4 + $0x1], 1 }

</bundles_post_ra>
